<compile_context>
chip_gen: v6e
topology: v6e:2x2x1
jax: 0.10.0
libtpu: 0.0.40
codegen_flags: <defaults>
</compile_context>

<pallas_src>
import functools

import jax
import jax.numpy as jnp
from jax.experimental import pallas as pl
from jax.experimental.pallas import tpu as pltpu


def _round_up(x: int, m: int) -> int:
    return ((x + m - 1) // m) * m


# ----------------------------------------------------------------------------
# Pallas kernel: fused multi-layer MLP on a row tile.  All (padded) weight
# matrices are resident in VMEM; the row (token) dimension is tiled over a
# 1-D "parallel" grid (megacore-shardable on v7x).
# ----------------------------------------------------------------------------
def _mlp_kernel(*refs, num_weights: int, compute_dtype):
    # refs = (x_ref, w0_ref, w1_ref, ..., o_ref)
    x_ref = refs[0]
    w_refs = refs[1:1 + num_weights]
    o_ref = refs[1 + num_weights]

    # Native-dtype operands straight to the MXU; f32 accumulation only.
    h = x_ref[...]
    for i, w_ref in enumerate(w_refs):
        acc = jnp.dot(h, w_ref[...], preferred_element_type=jnp.float32)
        if i < num_weights - 1:
            acc = jnp.maximum(acc, 0.0)          # ReLU between layers only
            h = acc.astype(compute_dtype)        # back to native dtype for next MXU pass
        else:
            h = acc
    o_ref[...] = h.astype(o_ref.dtype)


def mlp_pallas(x2d, weights, *, tm: int = 256, single_buffer_weights=None):
    """x2d: [M, C_in]; weights: list of (C_in_i, C_out_i) arrays."""
    M, c_in = x2d.shape
    out_c = weights[-1].shape[1]
    nw = len(weights)
    dtype = x2d.dtype
    itemsize = jnp.dtype(dtype).itemsize

    # ---- lane-dense padding: every feature dim -> multiple of 128 ----------
    cin_p = _round_up(c_in, 128)
    w_p = []
    for w in weights:
        ci, co = w.shape
        w_p.append(jnp.pad(w.astype(dtype),
                           ((0, _round_up(ci, 128) - ci),
                            (0, _round_up(co, 128) - co))))
    out_c_p = w_p[-1].shape[1]

    # ---- row tiling: big tiles, ragged tail handled by zero-padding rows ---
    tm = _round_up(max(tm, 8), 8)
    tm_eff = min(tm, _round_up(M, 8))     # don't over-pad tiny inputs
    m_p = _round_up(M, tm_eff)
    x_p = jnp.pad(x2d, ((0, m_p - M), (0, cin_p - c_in)))
    grid = (m_p // tm_eff,)

    # ---- VMEM budget & weight buffering -------------------------------------
    w_bytes = sum(int(w.size) * itemsize for w in w_p)
    if single_buffer_weights is None:
        # Weights are grid-invariant (index_map == (0,0)); single-buffer them
        # when double-buffering would pressure v7x's 64 MiB VMEM.
        single_buffer_weights = (2 * w_bytes > (24 << 20))
    w_spec_kwargs = {"pipeline_mode": pl.Buffered(1)} if single_buffer_weights else {}
    w_buffers = 1 if single_buffer_weights else 2
    # TODO(synk): for hidden/out dims whose weights cannot stay resident even
    # single-buffered (v7x 64 MiB), add a feature-dim grid axis and re-stream
    # weight panels instead of replicating full matrices.

    widths = [cin_p] + [w.shape[1] for w in w_p]
    tile_bytes = 2 * tm_eff * (cin_p + out_c_p) * itemsize          # x/out, double-buffered
    inter_bytes = tm_eff * max(widths) * 4 * (nw + 2)               # f32 intermediates
    est = tile_bytes + w_buffers * w_bytes + inter_bytes + (2 << 20)
    vmem_limit = int(min(max(est, 16 << 20), 64 << 20))

    flops = 2 * m_p * sum(int(w.shape[0]) * int(w.shape[1]) for w in w_p)
    bytes_accessed = int(x_p.size) * itemsize + w_bytes + m_p * out_c_p * itemsize
    cost = pl.CostEstimate(flops=int(flops), transcendentals=0,
                           bytes_accessed=int(bytes_accessed))

    in_specs = [pl.BlockSpec((tm_eff, cin_p), lambda i: (i, 0))]
    for w in w_p:
        ci, co = w.shape
        in_specs.append(pl.BlockSpec((ci, co), lambda i: (0, 0), **w_spec_kwargs))

    kernel = functools.partial(_mlp_kernel, num_weights=nw, compute_dtype=dtype)

    y_p = pl.pallas_call(
        kernel,
        out_shape=jax.ShapeDtypeStruct((m_p, out_c_p), dtype),
        grid_spec=pltpu.PrefetchScalarGridSpec(
            num_scalar_prefetch=0,
            grid=grid,
            in_specs=in_specs,
            out_specs=pl.BlockSpec((tm_eff, out_c_p), lambda i: (i, 0)),
        ),
        compiler_params=pltpu.CompilerParams(
            dimension_semantics=("parallel",),   # megacore sharding on v7x
            vmem_limit_bytes=vmem_limit,
        ),
        cost_estimate=cost,
    )(x_p, *w_p)

    # strip the row / lane padding
    return y_p[:M, :out_c]


# ----------------------------------------------------------------------------
# Module-equivalent wrapper (parameter construction in plain JAX).
# ----------------------------------------------------------------------------
def make_mlp_params(key, in_channels, hidden_layers, hidden_channels=None,
                    out_channels=None, dtype=jnp.float32):
    """Replicates Mlp.__init__ layer-shape logic; bias=False, act=ReLU."""
    hidden_channels = hidden_channels or in_channels
    out_channels = out_channels or hidden_channels
    if isinstance(hidden_channels, int):
        hidden_channels = [hidden_channels] * (hidden_layers - 1)
    else:
        assert len(hidden_channels) == hidden_layers - 1

    if hidden_layers <= 1:
        # hidden_layers==0 -> single Linear in the original; hidden_layers==1
        # would index an empty list in the original module -- treat it as a
        # single Linear(in, out) here instead of crashing.
        dims = [(in_channels, out_channels)]
    else:
        dims = [(in_channels, hidden_channels[0])]
        for i in range(1, hidden_layers - 1):
            dims.append((hidden_channels[i - 1], hidden_channels[i]))
        dims.append((hidden_channels[-1], out_channels))

    weights = []
    for cin, cout in dims:
        key, sub = jax.random.split(key)
        bound = 1.0 / jnp.sqrt(cin)          # kaiming-uniform-ish, like nn.Linear
        w = jax.random.uniform(sub, (cin, cout), dtype=dtype,
                               minval=-bound, maxval=bound)
        weights.append(w)
    return weights


def mlp_forward(x, weights):
    """x: [..., C_in] -> [..., C_out] (fused Pallas kernel on the hot path)."""
    lead = x.shape[:-1]
    x2d = x.reshape(-1, x.shape[-1])
    y2d = mlp_pallas(x2d, weights)
    return y2d.reshape(*lead, weights[-1].shape[1])


def mlp_reference(x, weights):
    h = x
    for i, w in enumerate(weights):
        h = jnp.dot(h, w, preferred_element_type=jnp.float32).astype(x.dtype)
        if i < len(weights) - 1:
            h = jnp.maximum(h, 0.0)
    return h


if __name__ == "__main__":
    key = jax.random.PRNGKey(0)
    k_x, k_w = jax.random.split(key)

    # small shapes consistent with the module: Linear over the last axis
    B, N, C_in = 2, 8, 32
    hidden_layers, hidden_channels, out_channels = 2, 64, 32

    x = jax.random.normal(k_x, (B, N, C_in), dtype=jnp.float32)
    weights = make_mlp_params(k_w, C_in, hidden_layers,
                              hidden_channels=hidden_channels,
                              out_channels=out_channels)

    y = jax.block_until_ready(mlp_forward(x, weights))
    y_ref = mlp_reference(x, weights)

    assert y.shape == (B, N, out_channels), y.shape
    # f32 path: zero-padding is exact, so this should match tightly.
    assert jnp.allclose(y, y_ref, atol=1e-5, rtol=1e-5), "mismatch vs reference"

    print("KERNEL_OK")
</pallas_src>

<mosaic_0001>
module attributes {stable_mosaic.version = 11 : i64} {
  func.func @_mlp_kernel(%arg0: i32, %arg1: memref<16x128xf32, #tpu.memory_space<vmem>>, %arg2: memref<128x128xf32, #tpu.memory_space<vmem>>, %arg3: memref<128x128xf32, #tpu.memory_space<vmem>>, %arg4: memref<16x128xf32, #tpu.memory_space<vmem>>) attributes {dimension_semantics = [#tpu.dimension_semantics<parallel>], iteration_bounds = array<i64: 1>, scalar_prefetch = 0 : i64, scratch_operands = 0 : i64, tpu.core_type = #tpu.core_type<tc>, window_params = [{transform_indices = @transform_0, window_bounds = array<i64: 16, 128>}, {pipeline_mode = #tpu.pipeline_mode<synchronous>, transform_indices = @transform_1, window_bounds = array<i64: 128, 128>}, {pipeline_mode = #tpu.pipeline_mode<synchronous>, transform_indices = @transform_2, window_bounds = array<i64: 128, 128>}, {transform_indices = @transform_3, window_bounds = array<i64: 16, 128>}]} {
    %c0 = arith.constant 0 : index
    %c0_0 = arith.constant 0 : index
    %0 = vector.load %arg1[%c0, %c0_0] : memref<16x128xf32, #tpu.memory_space<vmem>>, vector<16x128xf32>
    %c0_1 = arith.constant 0 : index
    %c0_2 = arith.constant 0 : index
    %1 = vector.load %arg2[%c0_1, %c0_2] : memref<128x128xf32, #tpu.memory_space<vmem>>, vector<128x128xf32>
    %cst = arith.constant dense<0.000000e+00> : vector<16x128xf32>
    %2 = tpu.matmul %0, %1, %cst {dimension_numbers = #tpu.dot_dimension_numbers<[1], [0], [0], [1], [0, 0, 1, 1], [], []>} : vector<16x128xf32>, vector<128x128xf32>, vector<16x128xf32> -> vector<16x128xf32>
    %cst_3 = arith.constant 0.000000e+00 : f32
    %3 = vector.broadcast %cst_3 : f32 to vector<16x128xf32>
    %4 = arith.maximumf %2, %3 : vector<16x128xf32>
    %c0_4 = arith.constant 0 : index
    %c0_5 = arith.constant 0 : index
    %5 = vector.load %arg3[%c0_4, %c0_5] : memref<128x128xf32, #tpu.memory_space<vmem>>, vector<128x128xf32>
    %cst_6 = arith.constant dense<0.000000e+00> : vector<16x128xf32>
    %6 = tpu.matmul %4, %5, %cst_6 {dimension_numbers = #tpu.dot_dimension_numbers<[1], [0], [0], [1], [0, 0, 1, 1], [], []>} : vector<16x128xf32>, vector<128x128xf32>, vector<16x128xf32> -> vector<16x128xf32>
    %c0_7 = arith.constant 0 : index
    %c0_8 = arith.constant 0 : index
    %7 = vector.load %arg4[%c0_7, %c0_8] : memref<16x128xf32, #tpu.memory_space<vmem>>, vector<16x128xf32>
    tpu.vector_store %arg4[%c0_7, %c0_8], %6 {strides = array<i32>} : memref<16x128xf32, #tpu.memory_space<vmem>>, vector<16x128xf32>,
    return
  }
  func.func @transform_0(%arg0: i32) -> (i32, i32) {
    %c0_i32 = arith.constant 0 : i32
    %c0_i32_0 = arith.constant 0 : i32
    return %arg0, %c0_i32 : i32, i32
  }
  func.func @transform_1(%arg0: i32) -> (i32, i32) {
    %c0_i32 = arith.constant 0 : i32
    %c0_i32_0 = arith.constant 0 : i32
    %c0_i32_1 = arith.constant 0 : i32
    return %c0_i32, %c0_i32_0 : i32, i32
  }
  func.func @transform_2(%arg0: i32) -> (i32, i32) {
    %c0_i32 = arith.constant 0 : i32
    %c0_i32_0 = arith.constant 0 : i32
    %c0_i32_1 = arith.constant 0 : i32
    return %c0_i32, %c0_i32_0 : i32, i32
  }
  func.func @transform_3(%arg0: i32) -> (i32, i32) {
    %c0_i32 = arith.constant 0 : i32
    %c0_i32_0 = arith.constant 0 : i32
    return %arg0, %c0_i32 : i32, i32
  }
}

</mosaic_0001>

<bundles_post_ra>
// kernel: tpu_custom_call.1
= control target key start
LH: loop header
LB: loop body
LE: loop exit
PB: predicated region body
PF: predicated region fallthrough
CT: control target
= control target key end

     0   :  { %8 = vsyncpa [#allocation3], 0  ;;  %s510_s0 = inlined_call_operand.hbm [shape: f32[16,128], index: 0, kind: input, shape index: {}]   ;;  %s511_s1 = inlined_call_operand.hbm [shape: f32[128,128], index: 1, kind: input, shape index: {}]   ;;  %s512_s2 = inlined_call_operand.hbm [shape: f32[128,128], index: 2, kind: input, shape index: {}]   ;;  %s513_s3 = inlined_call_operand.hbm [shape: f32[16,128], index: 3, kind: output, shape index: {}]  }
   0x1   :  { %9 = vsyncpa [#allocation6], 0 }
   0x2   :  { %10 = vsyncpa [#allocation4], 0  ;;  %s460_s12 = smov [#allocation5]   ;;  %s461_s14 = smov [#allocation2]  }
   0x3   :  { %s28_s13 = sshll.u32 %s460_s12, 4  ;;  %s16_s15 = sshll.u32 %s461_s14, 4  ;;  %s29_s13 = int_to_ptr.vmem [resolvable:$true] %s28_s13  ;;  %s17_s15 = int_to_ptr.vmem [resolvable:$true] %s16_s15 }
   0x4   :  { %s382_s16 = scalar_lea.vmem %s29_s13, 2048  ;;  %p387_p1 = scmp.lt.s32.totalorder %s29_s13, %s29_s13 }
   0x5   :  { %p383_p0 = scmp.ne.s32.totalorder %s29_s13, %s382_s16  ;;  %p388_p2 = scmp.lt.s32.totalorder %s382_s16, %s382_s16 }
   0x7   :  { %p389_p3 = por %p388_p2, %p387_p1 }
   0x9   :  { %p390_p4 = pnand %p389_p3, %p383_p0 }
   0xb   :  { %393 = shalt.err (!%p390_p4)
}
   0xc   :  { %s462_s17 = smov 128   ;;  %s463_s18 = smov 8  }
   0xd   :  { %34 = dma.hbm_to_vmem [thread:$0]  %s511_s1, 2048, %s29_s13, [#allocation6], %s462_s17, %s462_s17, %s463_s18  }
   0xe   :  { %s402_s21 = scalar_lea.vmem %s17_s15, 256  ;;  %p407_p6 = scmp.lt.s32.totalorder %s17_s15, %s17_s15 }
   0xf   :  { %p403_p5 = scmp.ne.s32.totalorder %s17_s15, %s402_s21  ;;  %p408_p7 = scmp.lt.s32.totalorder %s402_s21, %s402_s21 }
  0x11   :  { %p409_p8 = por %p408_p7, %p407_p6 }
  0x13   :  { %p410_p9 = pnand %p409_p8, %p403_p5 }
  0x15   :  { %413 = shalt.err (!%p410_p9)
}
  0x16   :  { %22 = dma.hbm_to_vmem [thread:$0]  %s510_s0, 256, %s17_s15, [#allocation3], %s462_s17, %s462_s17, %s463_s18  }
  0x17   :  { %s464_s24 = smov [#allocation7]  }
  0x18   :  { %s40_s25 = sshll.u32 %s464_s24, 4  ;;  %s41_s25 = int_to_ptr.vmem [resolvable:$true] %s40_s25 }
  0x19   :  { %s422_s26 = scalar_lea.vmem %s41_s25, 2048  ;;  %p427_p11 = scmp.lt.s32.totalorder %s41_s25, %s41_s25 }
  0x1a   :  { %p423_p10 = scmp.ne.s32.totalorder %s41_s25, %s422_s26  ;;  %p428_p12 = scmp.lt.s32.totalorder %s422_s26, %s422_s26 }
  0x1c   :  { %p429_p13 = por %p428_p12, %p427_p11 }
  0x1e   :  { %p430_p0 = pnand %p429_p13, %p423_p10 }
  0x20   :  { %433 = shalt.err (!%p430_p0)
}
  0x21   :  { %46 = dma.hbm_to_vmem [thread:$0]  %s512_s2, 2048, %s41_s25, [#allocation6], %s462_s17, %s462_s17, %s463_s18  }
  0x22   :  { %454 = dma.done.wait [#allocation3], 256  }
  0x23   :  { %455 = vsyncadd [#allocation3], 4294967040 }
  0x24   :  { %456 = dma.done.wait [#allocation6], 4096  }
  0x25   :  { %457 = vsyncadd [#allocation6], 4294963200  ;;  %v73_v0 = vld [vmem:[#allocation5 + $0x78] sm:$0xff]  ;;  %v72_v1 = vld [vmem:[#allocation5 + $0x70] sm:$0xff]  ;;  %s465_s0 = smov [#allocation8]  }
  0x26   :  { %298 = vmatprep.subr.mxu0 %v73_v0  ;;  %v71_v2 = vld [vmem:[#allocation5 + $0x68] sm:$0xff]  ;;  %v70_v3 = vld [vmem:[#allocation5 + $0x60] sm:$0xff]  ;;  %v56_v4 = vld [vmem:[#allocation2] sm:$0xff]  ;;  %s249_s2 = sshll.u32 %s465_s0, 4  ;;  %s250_s2 = int_to_ptr.vmem [resolvable:$true] %s249_s2 }
  0x27   :  { %299 = vmatpush3.msra.mxu0 %v73_v0  ;;  %v69_v5 = vld [vmem:[#allocation5 + $0x58] sm:$0xff]  ;;  %330 = vmatprep.mubr.f32.mxu0 %v56_v4  ;;  %v165_v7 = vld [vmem:[#allocation7 + $0x70] sm:$0xff]  ;;  %v164_v9 = vld [vmem:[#allocation7 + $0x68] sm:$0xff]  ;;  %s434_s28 = scalar_lea.vmem %s250_s2, 256  ;;  %p439_p2 = scmp.lt.s32.totalorder %s250_s2, %s250_s2 }
  0x28   :  { %300 = vmatprep.subr.mxu0 %v72_v1  ;;  %v166_v6 = vld [vmem:[#allocation7 + $0x78] sm:$0xff]  ;;  %v68_v8 = vld [vmem:[#allocation5 + $0x50] sm:$0xff]  ;;  %v67_v10 = vld [vmem:[#allocation5 + $0x48] sm:$0xff]  ;;  %p435_p1 = scmp.ne.s32.totalorder %s250_s2, %s434_s28  ;;  %p440_p3 = scmp.lt.s32.totalorder %s434_s28, %s434_s28 }
  0x29   :  { %301 = vmatpush3.msra.mxu0 %v72_v1  ;;  %333 = vmatprep.subr.mxu1 %v166_v6  ;;  %v163_v11 = vld [vmem:[#allocation7 + $0x60] sm:$0xff]  ;;  %v162_v13 = vld [vmem:[#allocation7 + $0x58] sm:$0xff]  ;;  %v161_v15 = vld [vmem:[#allocation7 + $0x50] sm:$0xff] }
  0x2a   :  { %302 = vmatprep.subr.mxu0 %v71_v2  ;;  %334 = vmatpush3.msra.mxu1 %v166_v6  ;;  %v66_v12 = vld [vmem:[#allocation5 + $0x40] sm:$0xff]  ;;  %v65_v14 = vld [vmem:[#allocation5 + $0x38] sm:$0xff]  ;;  %v64_v16 = vld [vmem:[#allocation5 + $0x30] sm:$0xff]  ;;  %p441_p4 = por %p440_p3, %p439_p2 }
  0x2b   :  { %303 = vmatpush3.msra.mxu0 %v71_v2  ;;  %335 = vmatprep.subr.mxu1 %v165_v7  ;;  %v160_v17 = vld [vmem:[#allocation7 + $0x48] sm:$0xff]  ;;  %v159_v19 = vld [vmem:[#allocation7 + $0x40] sm:$0xff]  ;;  %v158_v21 = vld [vmem:[#allocation7 + $0x38] sm:$0xff] }
  0x2c   :  { %304 = vmatprep.subr.mxu0 %v70_v3  ;;  %336 = vmatpush3.msra.mxu1 %v165_v7  ;;  %v63_v18 = vld [vmem:[#allocation5 + $0x28] sm:$0xff]  ;;  %v62_v20 = vld [vmem:[#allocation5 + $0x20] sm:$0xff]  ;;  %v61_v22 = vld [vmem:[#allocation5 + $0x18] sm:$0xff]  ;;  %p442_p5 = pnand %p441_p4, %p435_p1 }
  0x2d   :  { %305 = vmatpush3.msra.mxu0 %v70_v3  ;;  %337 = vmatprep.subr.mxu1 %v164_v9  ;;  %v157_v23 = vld [vmem:[#allocation7 + $0x30] sm:$0xff]  ;;  %v156_v25 = vld [vmem:[#allocation7 + $0x28] sm:$0xff]  ;;  %v155_v27 = vld [vmem:[#allocation7 + $0x20] sm:$0xff] }
  0x2e   :  { %306 = vmatprep.subr.mxu0 %v69_v5  ;;  %338 = vmatpush3.msra.mxu1 %v164_v9  ;;  %v60_v24 = vld [vmem:[#allocation5 + $0x10] sm:$0xff]  ;;  %v59_v26 = vld [vmem:[#allocation5 + $0x8] sm:$0xff]  ;;  %v58_v28 = vld [vmem:[#allocation5] sm:$0xff] }
  0x2f   :  { %307 = vmatpush3.msra.mxu0 %v69_v5  ;;  %339 = vmatprep.subr.mxu1 %v163_v11  ;;  %v154_v29 = vld [vmem:[#allocation7 + $0x18] sm:$0xff]  ;;  %v153_v31 = vld [vmem:[#allocation7 + $0x10] sm:$0xff]  ;;  %v152_v32 = vld [vmem:[#allocation7 + $0x8] sm:$0xff] }
  0x30   :  { %308 = vmatprep.subr.mxu0 %v68_v8  ;;  %340 = vmatpush3.msra.mxu1 %v163_v11  ;;  %v57_v30 = vld [vmem:[#allocation2 + $0x8] sm:$0xff]  ;;  %v151_v33 = vld [vmem:[#allocation7] sm:$0xff] }
  0x31   :  { %309 = vmatpush3.msra.mxu0 %v68_v8  ;;  %341 = vmatprep.subr.mxu1 %v162_v13 }
  0x32   :  { %310 = vmatprep.subr.mxu0 %v67_v10  ;;  %342 = vmatpush3.msra.mxu1 %v162_v13 }
  0x33   :  { %311 = vmatpush3.msra.mxu0 %v67_v10  ;;  %343 = vmatprep.subr.mxu1 %v161_v15 }
  0x34   :  { %312 = vmatprep.subr.mxu0 %v66_v12  ;;  %344 = vmatpush3.msra.mxu1 %v161_v15 }
  0x35   :  { %313 = vmatpush3.msra.mxu0 %v66_v12  ;;  %345 = vmatprep.subr.mxu1 %v160_v17 }
  0x36   :  { %314 = vmatprep.subr.mxu0 %v65_v14  ;;  %346 = vmatpush3.msra.mxu1 %v160_v17 }
  0x37   :  { %315 = vmatpush3.msra.mxu0 %v65_v14  ;;  %347 = vmatprep.subr.mxu1 %v159_v19 }
  0x38   :  { %316 = vmatprep.subr.mxu0 %v64_v16  ;;  %348 = vmatpush3.msra.mxu1 %v159_v19 }
  0x39   :  { %317 = vmatpush3.msra.mxu0 %v64_v16  ;;  %349 = vmatprep.subr.mxu1 %v158_v21 }
  0x3a   :  { %318 = vmatprep.subr.mxu0 %v63_v18  ;;  %350 = vmatpush3.msra.mxu1 %v158_v21 }
  0x3b   :  { %319 = vmatpush3.msra.mxu0 %v63_v18  ;;  %351 = vmatprep.subr.mxu1 %v157_v23 }
  0x3c   :  { %320 = vmatprep.subr.mxu0 %v62_v20  ;;  %352 = vmatpush3.msra.mxu1 %v157_v23 }
  0x3d   :  { %321 = vmatpush3.msra.mxu0 %v62_v20  ;;  %353 = vmatprep.subr.mxu1 %v156_v25 }
  0x3e   :  { %322 = vmatprep.subr.mxu0 %v61_v22  ;;  %354 = vmatpush3.msra.mxu1 %v156_v25 }
  0x3f   :  { %323 = vmatpush3.msra.mxu0 %v61_v22  ;;  %355 = vmatprep.subr.mxu1 %v155_v27 }
  0x40   :  { %324 = vmatprep.subr.mxu0 %v60_v24  ;;  %356 = vmatpush3.msra.mxu1 %v155_v27 }
  0x41   :  { %325 = vmatpush3.msra.mxu0 %v60_v24  ;;  %357 = vmatprep.subr.mxu1 %v154_v29 }
  0x42   :  { %326 = vmatprep.subr.mxu0 %v59_v26  ;;  %358 = vmatpush3.msra.mxu1 %v154_v29 }
  0x43   :  { %327 = vmatpush3.msra.mxu0 %v59_v26  ;;  %359 = vmatprep.subr.mxu1 %v153_v31 }
  0x44   :  { %328 = vmatprep.subr.mxu0 %v58_v28  ;;  %360 = vmatpush3.msra.mxu1 %v153_v31 }
  0x45   :  { %329 = vmatpush3.msra.mxu0 %v58_v28  ;;  %361 = vmatprep.subr.mxu1 %v152_v32 }
  0x46   :  { %331 = vmatmul.mubr.f32.vlgmr.msra.gmra.mxu0 %v57_v30  ;;  %362 = vmatpush3.msra.mxu1 %v152_v32 }
  0x47   :  { %363 = vmatprep.subr.mxu1 %v151_v33 }
  0x48   :  { %364 = vmatpush3.msra.mxu1 %v151_v33 }
 0x106   :  { %v332_v34 = vpop.f32.mrf.mxu0 }
 0x107   :  { %v150_v37 = vmax.f32 %v332_v34, 0.0 }
 0x108   :  { %v140_v35 = vpop.f32.mrf.mxu0 }
 0x109   :  { %v149_v36 = vmax.f32 %v140_v35, 0.0 }
 0x10b   :  { %365 = vmatprep.mubr.f32.mxu1 %v149_v36 }
 0x10c   :  { %366 = vmatmul.mubr.f32.vlgmr.msra.gmra.mxu1 %v150_v37 }
 0x1cc   :  { %v367_v38 = vpop.f32.mrf.mxu1 }
 0x1cd   :  { %243 = vst [vmem:[#allocation8 + $0x8] sm:$0xff] %v367_v38 }
 0x1ce   :  { %v233_v39 = vpop.f32.mrf.mxu1 }
 0x1cf   :  { %242 = vst [vmem:[#allocation8] sm:$0xff] %v233_v39 }
 0x1d0   :  { %445 = shalt.err (!%p442_p5)
}
 0x1d1   :  { %255 = dma.vmem_to_hbm [thread:$0]  %s250_s2, 256, %s513_s3, [#allocation4], %s462_s17, %s462_s17, %s463_s18  }
 0x1d2   :  { %458 = dma.done.wait [#allocation4], 256  }
 0x1d3   :  { %459 = vsyncadd [#allocation4], 4294967040 }
 0x1d4   :  { %259 = vsyncpa [#allocation3], 1 }
 0x1d5   :  { %260 = vsyncpa [#allocation6], 1 }
 0x1d6   :  { %261 = vsyncpa [#allocation4], 1 }

</bundles_post_ra>
